<compile_context>
chip_gen: v7x
topology: tpu7x:2x2x1
jax: 0.10.0
libtpu: 0.0.40
codegen_flags: <defaults>
</compile_context>

<pallas_src>
from functools import partial

import jax
import jax.numpy as jnp
from jax.experimental import pallas as pl
from jax.experimental.pallas import tpu as pltpu

EPS = 1e-5

# MXU operand dtype for the pointwise (1x1) matmul.  jnp.float32 keeps exact numerical
# parity with the f32 PyTorch reference; flip to jnp.bfloat16 on v6e/v7x for ~2x MXU
# throughput and half the resident-weight VMEM (costs ~1e-2 abs error through the BNs).
MXU_DTYPE = jnp.float32


def _pick_row_tile(rows, max_tile=512):
    """Largest multiple-of-8 divisor of `rows` that is <= max_tile, preferring a choice
    that leaves >= 2 grid steps so the v7x megacore keeps both TensorCores busy.
    Falls back to one full-height block when `rows` has no multiple-of-8 divisor."""
    divs = [d for d in range(8, min(rows, max_tile) + 1, 8) if rows % d == 0]
    if not divs:
        return rows
    two_plus = [d for d in divs if rows // d >= 2]
    return max(two_plus) if two_plus else max(divs)


# ----------------------------------------------------------------------------
# Kernels.  Activations use the lane-flattened layout: rows -> sublanes, W*C -> lanes.
# ----------------------------------------------------------------------------
def _dw_kernel(xp_ref, wdw_ref, y_ref, stat_ref, *, h, w, cin):
    """Pass A: raw depthwise 3x3 on one padded image + packed sum/sumsq row.

    xp_ref  : (h + 2, (w + 2) * cin)  zero-padded image, lane-flattened
    wdw_ref : (3, 3, 1, w * cin)      per-tap weights, pre-tiled along W
    y_ref   : (h, w * cin)            raw depthwise output
    stat_ref: (1, 2 * w * cin)        [sum | sumsq] packed into one 128*-lane row
    """
    wc = w * cin
    xf = xp_ref[...]
    # Centre tap initialises the accumulator (no zeros materialisation + add).
    acc = xf[1:1 + h, cin:cin + wc] * wdw_ref[1, 1]
    for ki in range(3):                      # static unroll -> LLO can interleave taps
        for kj in range(3):
            if ki == 1 and kj == 1:
                continue
            acc = acc + xf[ki:ki + h, kj * cin:kj * cin + wc] * wdw_ref[ki, kj]
    y_ref[...] = acc
    stat_ref[...] = jnp.concatenate(
        [jnp.sum(acc, axis=0, keepdims=True),
         jnp.sum(acc * acc, axis=0, keepdims=True)], axis=-1)


def _pw_kernel(y_ref, s1_ref, t1_ref, wbig_ref, z_ref, stat_ref):
    """Pass B: BN1 affine + ReLU + block-diagonal 1x1-conv matmul; emits raw z + stats.

    y_ref   : (tile_r, w * cin)   raw depthwise output rows (N*H folded into rows)
    s1/t1   : (1, w * cin)        folded BN1 scale / shift, tiled along W
    wbig_ref: (w * cin, w * cout) kron(I_W, W_pw) -> output stays lane-dense
    z_ref   : (tile_r, w * cout)  raw pointwise output
    stat_ref: (1, 2 * w * cout)   [sum | sumsq] packed into one lane-dense row
    """
    r = jnp.maximum(y_ref[...] * s1_ref[...] + t1_ref[...], 0.0)
    z = jnp.dot(r.astype(wbig_ref.dtype), wbig_ref[...],
                preferred_element_type=jnp.float32)
    z_ref[...] = z
    stat_ref[...] = jnp.concatenate(
        [jnp.sum(z, axis=0, keepdims=True),
         jnp.sum(z * z, axis=0, keepdims=True)], axis=-1)


def _bn_relu_kernel(z_ref, s2_ref, t2_ref, out_ref):
    """Pass C: BN2 affine + ReLU, lane-dense (tile_r, W*Cout) stores."""
    out_ref[...] = jnp.maximum(z_ref[...] * s2_ref[...] + t2_ref[...], 0.0)


# ----------------------------------------------------------------------------
# Wrapper
# ----------------------------------------------------------------------------
@jax.jit
def depth_separable_convolution(x_nchw, params):
    """x_nchw: (N, Cin, H, W) float32. Returns (N, Cout, H, W) float32."""
    w_dw, b_dw, g1, be1, w_pw, b_pw, g2, be2 = params
    del b_dw, b_pw          # conv biases are exactly cancelled by BN mean subtraction

    N, Cin, H, W = x_nchw.shape
    Cout = w_pw.shape[1]
    f32 = jnp.float32
    WC_in, WC_out = W * Cin, W * Cout
    P = N * H * W                                       # positions per channel

    cparams = pltpu.CompilerParams(
        dimension_semantics=("parallel",),              # every grid axis is independent
        vmem_limit_bytes=48 * 1024 * 1024)              # > default scoped, < v7x 64 MiB

    # ---- glue: NCHW -> lane-flattened zero-padded NHWC (single pad, no halo copies) --
    x = jnp.transpose(x_nchw, (0, 2, 3, 1)).astype(f32)          # (N, H, W, Cin)
    xp = jnp.pad(x, ((0, 0), (1, 1), (1, 1), (0, 0)))            # (N, H+2, W+2, Cin)
    xpf = xp.reshape(N, H + 2, (W + 2) * Cin)                    # flatten W,C -> lanes

    def _tile_w(v, reps):                               # (..., C) -> (..., reps*C)
        return jnp.tile(v, (1,) * (v.ndim - 1) + (reps,))

    wdw = _tile_w(w_dw, W).reshape(3, 3, 1, WC_in)      # per-tap weights tiled along W

    # ---- pass A: raw depthwise conv + per-image packed stats ------------------------
    # One block per padded image (halo comes for free, input read exactly once).
    # TODO(synk): for very tall images, row-tile this pass with a manual halo DMA
    # (pl.ANY + pltpu.make_async_copy) instead of whole-image blocks.
    y, stat1 = pl.pallas_call(
        partial(_dw_kernel, h=H, w=W, cin=Cin),
        grid=(N,),
        in_specs=[pl.BlockSpec((None, H + 2, (W + 2) * Cin), lambda n: (n, 0, 0)),
                  pl.BlockSpec((3, 3, 1, WC_in), lambda n: (0, 0, 0, 0))],
        out_specs=(pl.BlockSpec((None, H, WC_in), lambda n: (n, 0, 0)),
                   pl.BlockSpec((None, 1, 2 * WC_in), lambda n: (n, 0, 0))),
        out_shape=(jax.ShapeDtypeStruct((N, H, WC_in), f32),
                   jax.ShapeDtypeStruct((N, 1, 2 * WC_in), f32)),
        compiler_params=cparams,
    )(xpf, wdw)

    # Tiny cross-image reduction + BN1 folding (scale/shift) in the wrapper.
    tot1 = jnp.sum(stat1, axis=(0, 1))                               # (2*W*Cin,)
    sum1 = tot1[:WC_in].reshape(W, Cin).sum(axis=0)
    sq1 = tot1[WC_in:].reshape(W, Cin).sum(axis=0)
    mu1 = sum1 / P
    var1 = jnp.maximum(sq1 / P - mu1 * mu1, 0.0)                     # biased batch var
    s1 = g1.reshape(-1) * jax.lax.rsqrt(var1 + EPS)
    t1 = be1.reshape(-1) - mu1 * s1
    s1_l = jnp.tile(s1, W).reshape(1, WC_in)
    t1_l = jnp.tile(t1, W).reshape(1, WC_in)

    # ---- pass B: BN1 + ReLU + 1x1 conv (MXU), N*H folded into the row axis ----------
    R = N * H
    y_flat = y.reshape(R, WC_in)                         # free reshape (contiguous)
    tile_r = _pick_row_tile(R)
    n_r = R // tile_r

    # Block-diagonal kron(I_W, Wpw) keeps the matmul output directly in the lane-dense
    # (rows, W*Cout) layout -> unmasked 128-lane stores, no in-kernel relayouts.
    # TODO(synk): for production-sized W, tile the block-diagonal structure (or use a
    # (rows*W, Cin) x (Cin, Cout) formulation) instead of a dense W^2-scaling kron, and
    # single-buffer the replicated weight spec on v7x (64 MiB VMEM).
    wbig = jnp.kron(jnp.eye(W, dtype=f32), w_pw.astype(f32)).astype(MXU_DTYPE)

    z, stat2 = pl.pallas_call(
        _pw_kernel,
        grid=(n_r,),
        in_specs=[pl.BlockSpec((tile_r, WC_in), lambda i: (i, 0)),
                  pl.BlockSpec((1, WC_in), lambda i: (0, 0)),
                  pl.BlockSpec((1, WC_in), lambda i: (0, 0)),
                  pl.BlockSpec((WC_in, WC_out), lambda i: (0, 0))],
        out_specs=(pl.BlockSpec((tile_r, WC_out), lambda i: (i, 0)),
                   pl.BlockSpec((None, 1, 2 * WC_out), lambda i: (i, 0, 0))),
        out_shape=(jax.ShapeDtypeStruct((R, WC_out), f32),
                   jax.ShapeDtypeStruct((n_r, 1, 2 * WC_out), f32)),
        compiler_params=cparams,
    )(y_flat, s1_l, t1_l, wbig)

    tot2 = jnp.sum(stat2, axis=(0, 1))                               # (2*W*Cout,)
    sum2 = tot2[:WC_out].reshape(W, Cout).sum(axis=0)
    sq2 = tot2[WC_out:].reshape(W, Cout).sum(axis=0)
    mu2 = sum2 / P
    var2 = jnp.maximum(sq2 / P - mu2 * mu2, 0.0)
    s2 = g2.reshape(-1) * jax.lax.rsqrt(var2 + EPS)
    t2 = be2.reshape(-1) - mu2 * s2
    s2_l = jnp.tile(s2, W).reshape(1, WC_out)
    t2_l = jnp.tile(t2, W).reshape(1, WC_out)

    # ---- pass C: BN2 affine + ReLU (pure element-wise, lane-dense output) -----------
    out_flat = pl.pallas_call(
        _bn_relu_kernel,
        grid=(n_r,),
        in_specs=[pl.BlockSpec((tile_r, WC_out), lambda i: (i, 0)),
                  pl.BlockSpec((1, WC_out), lambda i: (0, 0)),
                  pl.BlockSpec((1, WC_out), lambda i: (0, 0))],
        out_specs=pl.BlockSpec((tile_r, WC_out), lambda i: (i, 0)),
        out_shape=jax.ShapeDtypeStruct((R, WC_out), f32),
        compiler_params=cparams,
    )(z, s2_l, t2_l)

    out_nhwc = out_flat.reshape(N, H, W, Cout)
    return jnp.transpose(out_nhwc, (0, 3, 1, 2))                     # NHWC -> NCHW


# ----------------------------------------------------------------------------
# Pure-JAX reference (lax.conv) for correctness checking.
# ----------------------------------------------------------------------------
def _reference_nchw(x_nchw, params):
    w_dw, b_dw, g1, be1, w_pw, b_pw, g2, be2 = params
    x = jnp.transpose(x_nchw, (0, 2, 3, 1))
    Cin = x.shape[-1]
    y = jax.lax.conv_general_dilated(
        x, w_dw.reshape(3, 3, 1, Cin), (1, 1), ((1, 1), (1, 1)),
        dimension_numbers=('NHWC', 'HWIO', 'NHWC'),
        feature_group_count=Cin,
        precision=jax.lax.Precision.HIGHEST) + b_dw.reshape(1, 1, 1, Cin)
    mu = y.mean(axis=(0, 1, 2))
    var = ((y - mu) ** 2).mean(axis=(0, 1, 2))
    y = jnp.maximum((y - mu) / jnp.sqrt(var + EPS) * g1.reshape(-1) + be1.reshape(-1), 0.0)
    z = jnp.einsum('nhwc,co->nhwo', y, w_pw,
                   precision=jax.lax.Precision.HIGHEST) + b_pw.reshape(-1)
    mu2 = z.mean(axis=(0, 1, 2))
    var2 = ((z - mu2) ** 2).mean(axis=(0, 1, 2))
    z = jnp.maximum((z - mu2) / jnp.sqrt(var2 + EPS) * g2.reshape(-1) + be2.reshape(-1), 0.0)
    return jnp.transpose(z, (0, 3, 1, 2))


if __name__ == "__main__":
    N, Cin, H, W, Cout = 2, 4, 16, 16, 8

    key = jax.random.PRNGKey(0)
    ks = jax.random.split(key, 9)
    x = jax.random.normal(ks[0], (N, Cin, H, W), jnp.float32)

    # Deterministic synthetic parameters (shapes match the PyTorch module).
    w_dw = 0.3 * jax.random.normal(ks[1], (3, 3, Cin), jnp.float32)      # depthwise weights
    b_dw = 0.1 * jax.random.normal(ks[2], (1, Cin), jnp.float32)         # depthwise bias
    g1 = 1.0 + 0.1 * jax.random.normal(ks[3], (1, Cin), jnp.float32)     # BN1 gamma
    be1 = 0.1 * jax.random.normal(ks[4], (1, Cin), jnp.float32)          # BN1 beta
    w_pw = 0.3 * jax.random.normal(ks[5], (Cin, Cout), jnp.float32)      # pointwise weights
    b_pw = 0.1 * jax.random.normal(ks[6], (1, Cout), jnp.float32)        # pointwise bias
    g2 = 1.0 + 0.1 * jax.random.normal(ks[7], (1, Cout), jnp.float32)    # BN2 gamma
    be2 = 0.1 * jax.random.normal(ks[8], (1, Cout), jnp.float32)         # BN2 beta
    params = (w_dw, b_dw, g1, be1, w_pw, b_pw, g2, be2)

    out = jax.block_until_ready(depth_separable_convolution(x, params))
    assert out.shape == (N, Cout, H, W), out.shape

    ref = _reference_nchw(x, params)
    tol = 1e-3 if MXU_DTYPE == jnp.float32 else 3e-2
    if not jnp.allclose(out, ref, atol=tol, rtol=tol):
        err = jnp.max(jnp.abs(out - ref))
        raise AssertionError(f"Pallas kernel disagrees with JAX reference (max err {err})")

    print("KERNEL_OK")
</pallas_src>

<mosaic_0001>
module attributes {stable_mosaic.version = 11 : i64} {
  func.func @_dw_kernel(%arg0: i32, %arg1: memref<1x18x72xf32, #tpu.memory_space<vmem>>, %arg2: memref<3x3x1x64xf32, #tpu.memory_space<vmem>>, %arg3: memref<1x16x64xf32, #tpu.memory_space<vmem>>, %arg4: memref<1x1x128xf32, #tpu.memory_space<vmem>>) attributes {dimension_semantics = [#tpu.dimension_semantics<parallel>], iteration_bounds = array<i64: 2>, scalar_prefetch = 0 : i64, scratch_operands = 0 : i64, tpu.core_type = #tpu.core_type<tc>, window_params = [{transform_indices = @transform_0, window_bounds = array<i64: 1, 18, 72>}, {pipeline_mode = #tpu.pipeline_mode<synchronous>, transform_indices = @transform_1, window_bounds = array<i64: 3, 3, 1, 64>}, {transform_indices = @transform_2, window_bounds = array<i64: 1, 16, 64>}, {transform_indices = @transform_3, window_bounds = array<i64: 1, 1, 128>}]} {
    %c0 = arith.constant 0 : index
    %c0_0 = arith.constant 0 : index
    %c0_1 = arith.constant 0 : index
    %0 = vector.load %arg1[%c0, %c0_0, %c0_1] : memref<1x18x72xf32, #tpu.memory_space<vmem>>, vector<1x18x72xf32>
    %1 = vector.shape_cast %0 : vector<1x18x72xf32> to vector<18x72xf32>
    %2 = vector.extract_strided_slice %1 {offsets = [1, 4], sizes = [16, 64], strides = [1, 1]} : vector<18x72xf32> to vector<16x64xf32>
    %c1 = arith.constant 1 : index
    %c1_2 = arith.constant 1 : index
    %c0_3 = arith.constant 0 : index
    %c0_4 = arith.constant 0 : index
    %3 = vector.load %arg2[%c1, %c1_2, %c0_3, %c0_4] : memref<3x3x1x64xf32, #tpu.memory_space<vmem>>, vector<1x1x1x64xf32>
    %4 = vector.shape_cast %3 : vector<1x1x1x64xf32> to vector<1x64xf32>
    %5 = vector.broadcast %4 : vector<1x64xf32> to vector<16x64xf32>
    %6 = arith.mulf %2, %5 : vector<16x64xf32>
    %7 = vector.extract_strided_slice %1 {offsets = [0, 0], sizes = [16, 64], strides = [1, 1]} : vector<18x72xf32> to vector<16x64xf32>
    %c0_5 = arith.constant 0 : index
    %c0_6 = arith.constant 0 : index
    %c0_7 = arith.constant 0 : index
    %c0_8 = arith.constant 0 : index
    %8 = vector.load %arg2[%c0_5, %c0_6, %c0_7, %c0_8] : memref<3x3x1x64xf32, #tpu.memory_space<vmem>>, vector<1x1x1x64xf32>
    %9 = vector.shape_cast %8 : vector<1x1x1x64xf32> to vector<1x64xf32>
    %10 = vector.broadcast %9 : vector<1x64xf32> to vector<16x64xf32>
    %11 = arith.mulf %7, %10 : vector<16x64xf32>
    %12 = arith.addf %6, %11 : vector<16x64xf32>
    %13 = vector.extract_strided_slice %1 {offsets = [0, 4], sizes = [16, 64], strides = [1, 1]} : vector<18x72xf32> to vector<16x64xf32>
    %c0_9 = arith.constant 0 : index
    %c1_10 = arith.constant 1 : index
    %c0_11 = arith.constant 0 : index
    %c0_12 = arith.constant 0 : index
    %14 = vector.load %arg2[%c0_9, %c1_10, %c0_11, %c0_12] : memref<3x3x1x64xf32, #tpu.memory_space<vmem>>, vector<1x1x1x64xf32>
    %15 = vector.shape_cast %14 : vector<1x1x1x64xf32> to vector<1x64xf32>
    %16 = vector.broadcast %15 : vector<1x64xf32> to vector<16x64xf32>
    %17 = arith.mulf %13, %16 : vector<16x64xf32>
    %18 = arith.addf %12, %17 : vector<16x64xf32>
    %19 = vector.extract_strided_slice %1 {offsets = [0, 8], sizes = [16, 64], strides = [1, 1]} : vector<18x72xf32> to vector<16x64xf32>
    %c0_13 = arith.constant 0 : index
    %c2 = arith.constant 2 : index
    %c0_14 = arith.constant 0 : index
    %c0_15 = arith.constant 0 : index
    %20 = vector.load %arg2[%c0_13, %c2, %c0_14, %c0_15] : memref<3x3x1x64xf32, #tpu.memory_space<vmem>>, vector<1x1x1x64xf32>
    %21 = vector.shape_cast %20 : vector<1x1x1x64xf32> to vector<1x64xf32>
    %22 = vector.broadcast %21 : vector<1x64xf32> to vector<16x64xf32>
    %23 = arith.mulf %19, %22 : vector<16x64xf32>
    %24 = arith.addf %18, %23 : vector<16x64xf32>
    %25 = vector.extract_strided_slice %1 {offsets = [1, 0], sizes = [16, 64], strides = [1, 1]} : vector<18x72xf32> to vector<16x64xf32>
    %c1_16 = arith.constant 1 : index
    %c0_17 = arith.constant 0 : index
    %c0_18 = arith.constant 0 : index
    %c0_19 = arith.constant 0 : index
    %26 = vector.load %arg2[%c1_16, %c0_17, %c0_18, %c0_19] : memref<3x3x1x64xf32, #tpu.memory_space<vmem>>, vector<1x1x1x64xf32>
    %27 = vector.shape_cast %26 : vector<1x1x1x64xf32> to vector<1x64xf32>
    %28 = vector.broadcast %27 : vector<1x64xf32> to vector<16x64xf32>
    %29 = arith.mulf %25, %28 : vector<16x64xf32>
    %30 = arith.addf %24, %29 : vector<16x64xf32>
    %31 = vector.extract_strided_slice %1 {offsets = [1, 8], sizes = [16, 64], strides = [1, 1]} : vector<18x72xf32> to vector<16x64xf32>
    %c1_20 = arith.constant 1 : index
    %c2_21 = arith.constant 2 : index
    %c0_22 = arith.constant 0 : index
    %c0_23 = arith.constant 0 : index
    %32 = vector.load %arg2[%c1_20, %c2_21, %c0_22, %c0_23] : memref<3x3x1x64xf32, #tpu.memory_space<vmem>>, vector<1x1x1x64xf32>
    %33 = vector.shape_cast %32 : vector<1x1x1x64xf32> to vector<1x64xf32>
    %34 = vector.broadcast %33 : vector<1x64xf32> to vector<16x64xf32>
    %35 = arith.mulf %31, %34 : vector<16x64xf32>
    %36 = arith.addf %30, %35 : vector<16x64xf32>
    %37 = vector.extract_strided_slice %1 {offsets = [2, 0], sizes = [16, 64], strides = [1, 1]} : vector<18x72xf32> to vector<16x64xf32>
    %c2_24 = arith.constant 2 : index
    %c0_25 = arith.constant 0 : index
    %c0_26 = arith.constant 0 : index
    %c0_27 = arith.constant 0 : index
    %38 = vector.load %arg2[%c2_24, %c0_25, %c0_26, %c0_27] : memref<3x3x1x64xf32, #tpu.memory_space<vmem>>, vector<1x1x1x64xf32>
    %39 = vector.shape_cast %38 : vector<1x1x1x64xf32> to vector<1x64xf32>
    %40 = vector.broadcast %39 : vector<1x64xf32> to vector<16x64xf32>
    %41 = arith.mulf %37, %40 : vector<16x64xf32>
    %42 = arith.addf %36, %41 : vector<16x64xf32>
    %43 = vector.extract_strided_slice %1 {offsets = [2, 4], sizes = [16, 64], strides = [1, 1]} : vector<18x72xf32> to vector<16x64xf32>
    %c2_28 = arith.constant 2 : index
    %c1_29 = arith.constant 1 : index
    %c0_30 = arith.constant 0 : index
    %c0_31 = arith.constant 0 : index
    %44 = vector.load %arg2[%c2_28, %c1_29, %c0_30, %c0_31] : memref<3x3x1x64xf32, #tpu.memory_space<vmem>>, vector<1x1x1x64xf32>
    %45 = vector.shape_cast %44 : vector<1x1x1x64xf32> to vector<1x64xf32>
    %46 = vector.broadcast %45 : vector<1x64xf32> to vector<16x64xf32>
    %47 = arith.mulf %43, %46 : vector<16x64xf32>
    %48 = arith.addf %42, %47 : vector<16x64xf32>
    %49 = vector.extract_strided_slice %1 {offsets = [2, 8], sizes = [16, 64], strides = [1, 1]} : vector<18x72xf32> to vector<16x64xf32>
    %c2_32 = arith.constant 2 : index
    %c2_33 = arith.constant 2 : index
    %c0_34 = arith.constant 0 : index
    %c0_35 = arith.constant 0 : index
    %50 = vector.load %arg2[%c2_32, %c2_33, %c0_34, %c0_35] : memref<3x3x1x64xf32, #tpu.memory_space<vmem>>, vector<1x1x1x64xf32>
    %51 = vector.shape_cast %50 : vector<1x1x1x64xf32> to vector<1x64xf32>
    %52 = vector.broadcast %51 : vector<1x64xf32> to vector<16x64xf32>
    %53 = arith.mulf %49, %52 : vector<16x64xf32>
    %54 = arith.addf %48, %53 : vector<16x64xf32>
    %c0_36 = arith.constant 0 : index
    %c0_37 = arith.constant 0 : index
    %c0_38 = arith.constant 0 : index
    %55 = vector.load %arg3[%c0_36, %c0_37, %c0_38] : memref<1x16x64xf32, #tpu.memory_space<vmem>>, vector<1x16x64xf32>
    %56 = vector.shape_cast %55 : vector<1x16x64xf32> to vector<16x64xf32>
    %57 = vector.shape_cast %54 : vector<16x64xf32> to vector<1x16x64xf32>
    tpu.vector_store %arg3[%c0_36, %c0_37, %c0_38], %57 {strides = array<i32>} : memref<1x16x64xf32, #tpu.memory_space<vmem>>, vector<1x16x64xf32>,
    %cst = arith.constant dense<0.000000e+00> : vector<64xf32>
    %58 = vector.multi_reduction <add>, %54, %cst [0] : vector<16x64xf32> to vector<64xf32>
    %59 = vector.shape_cast %58 : vector<64xf32> to vector<1x64xf32>
    %60 = arith.mulf %54, %54 : vector<16x64xf32>
    %cst_39 = arith.constant dense<0.000000e+00> : vector<64xf32>
    %61 = vector.multi_reduction <add>, %60, %cst_39 [0] : vector<16x64xf32> to vector<64xf32>
    %62 = vector.shape_cast %61 : vector<64xf32> to vector<1x64xf32>
    %63 = tpu.concatenate %59, %62 in 1 : vector<1x64xf32>, vector<1x64xf32> -> vector<1x128xf32>
    %c0_40 = arith.constant 0 : index
    %c0_41 = arith.constant 0 : index
    %c0_42 = arith.constant 0 : index
    %64 = vector.load %arg4[%c0_40, %c0_41, %c0_42] : memref<1x1x128xf32, #tpu.memory_space<vmem>>, vector<1x1x128xf32>
    %65 = vector.shape_cast %64 : vector<1x1x128xf32> to vector<1x128xf32>
    %66 = vector.shape_cast %63 : vector<1x128xf32> to vector<1x1x128xf32>
    tpu.vector_store %arg4[%c0_40, %c0_41, %c0_42], %66 {strides = array<i32>} : memref<1x1x128xf32, #tpu.memory_space<vmem>>, vector<1x1x128xf32>,
    return
  }
  func.func @transform_0(%arg0: i32) -> (i32, i32, i32) {
    %c0_i32 = arith.constant 0 : i32
    %c0_i32_0 = arith.constant 0 : i32
    %c0_i32_1 = arith.constant 0 : i32
    return %arg0, %c0_i32, %c0_i32_0 : i32, i32, i32
  }
  func.func @transform_1(%arg0: i32) -> (i32, i32, i32, i32) {
    %c0_i32 = arith.constant 0 : i32
    %c0_i32_0 = arith.constant 0 : i32
    %c0_i32_1 = arith.constant 0 : i32
    %c0_i32_2 = arith.constant 0 : i32
    %c0_i32_3 = arith.constant 0 : i32
    return %c0_i32, %c0_i32_0, %c0_i32_1, %c0_i32_2 : i32, i32, i32, i32
  }
  func.func @transform_2(%arg0: i32) -> (i32, i32, i32) {
    %c0_i32 = arith.constant 0 : i32
    %c0_i32_0 = arith.constant 0 : i32
    %c0_i32_1 = arith.constant 0 : i32
    return %arg0, %c0_i32, %c0_i32_0 : i32, i32, i32
  }
  func.func @transform_3(%arg0: i32) -> (i32, i32, i32) {
    %c0_i32 = arith.constant 0 : i32
    %c0_i32_0 = arith.constant 0 : i32
    %c0_i32_1 = arith.constant 0 : i32
    return %arg0, %c0_i32, %c0_i32_0 : i32, i32, i32
  }
}

module attributes {stable_mosaic.version = 11 : i64} {
  func.func @_pw_kernel(%arg0: i32, %arg1: memref<16x64xf32, #tpu.memory_space<vmem>>, %arg2: memref<1x64xf32, #tpu.memory_space<vmem>>, %arg3: memref<1x64xf32, #tpu.memory_space<vmem>>, %arg4: memref<64x128xf32, #tpu.memory_space<vmem>>, %arg5: memref<16x128xf32, #tpu.memory_space<vmem>>, %arg6: memref<1x1x256xf32, #tpu.memory_space<vmem>>) attributes {dimension_semantics = [#tpu.dimension_semantics<parallel>], iteration_bounds = array<i64: 2>, scalar_prefetch = 0 : i64, scratch_operands = 0 : i64, tpu.core_type = #tpu.core_type<tc>, window_params = [{transform_indices = @transform_0, window_bounds = array<i64: 16, 64>}, {pipeline_mode = #tpu.pipeline_mode<synchronous>, transform_indices = @transform_1, window_bounds = array<i64: 1, 64>}, {pipeline_mode = #tpu.pipeline_mode<synchronous>, transform_indices = @transform_2, window_bounds = array<i64: 1, 64>}, {pipeline_mode = #tpu.pipeline_mode<synchronous>, transform_indices = @transform_3, window_bounds = array<i64: 64, 128>}, {transform_indices = @transform_4, window_bounds = array<i64: 16, 128>}, {transform_indices = @transform_5, window_bounds = array<i64: 1, 1, 256>}]} {
    %c0 = arith.constant 0 : index
    %c0_0 = arith.constant 0 : index
    %0 = vector.load %arg1[%c0, %c0_0] : memref<16x64xf32, #tpu.memory_space<vmem>>, vector<16x64xf32>
    %c0_1 = arith.constant 0 : index
    %c0_2 = arith.constant 0 : index
    %1 = vector.load %arg2[%c0_1, %c0_2] : memref<1x64xf32, #tpu.memory_space<vmem>>, vector<1x64xf32>
    %2 = vector.broadcast %1 : vector<1x64xf32> to vector<16x64xf32>
    %3 = arith.mulf %0, %2 : vector<16x64xf32>
    %c0_3 = arith.constant 0 : index
    %c0_4 = arith.constant 0 : index
    %4 = vector.load %arg3[%c0_3, %c0_4] : memref<1x64xf32, #tpu.memory_space<vmem>>, vector<1x64xf32>
    %5 = vector.broadcast %4 : vector<1x64xf32> to vector<16x64xf32>
    %6 = arith.addf %3, %5 : vector<16x64xf32>
    %cst = arith.constant 0.000000e+00 : f32
    %7 = vector.broadcast %cst : f32 to vector<16x64xf32>
    %8 = arith.maximumf %6, %7 : vector<16x64xf32>
    %c0_5 = arith.constant 0 : index
    %c0_6 = arith.constant 0 : index
    %9 = vector.load %arg4[%c0_5, %c0_6] : memref<64x128xf32, #tpu.memory_space<vmem>>, vector<64x128xf32>
    %cst_7 = arith.constant dense<0.000000e+00> : vector<16x128xf32>
    %10 = tpu.matmul %8, %9, %cst_7 {dimension_numbers = #tpu.dot_dimension_numbers<[1], [0], [0], [1], [0, 0, 1, 1], [], []>} : vector<16x64xf32>, vector<64x128xf32>, vector<16x128xf32> -> vector<16x128xf32>
    %c0_8 = arith.constant 0 : index
    %c0_9 = arith.constant 0 : index
    %11 = vector.load %arg5[%c0_8, %c0_9] : memref<16x128xf32, #tpu.memory_space<vmem>>, vector<16x128xf32>
    tpu.vector_store %arg5[%c0_8, %c0_9], %10 {strides = array<i32>} : memref<16x128xf32, #tpu.memory_space<vmem>>, vector<16x128xf32>,
    %cst_10 = arith.constant dense<0.000000e+00> : vector<128xf32>
    %12 = vector.multi_reduction <add>, %10, %cst_10 [0] : vector<16x128xf32> to vector<128xf32>
    %13 = vector.shape_cast %12 : vector<128xf32> to vector<1x128xf32>
    %14 = arith.mulf %10, %10 : vector<16x128xf32>
    %cst_11 = arith.constant dense<0.000000e+00> : vector<128xf32>
    %15 = vector.multi_reduction <add>, %14, %cst_11 [0] : vector<16x128xf32> to vector<128xf32>
    %16 = vector.shape_cast %15 : vector<128xf32> to vector<1x128xf32>
    %17 = tpu.concatenate %13, %16 in 1 : vector<1x128xf32>, vector<1x128xf32> -> vector<1x256xf32>
    %c0_12 = arith.constant 0 : index
    %c0_13 = arith.constant 0 : index
    %c0_14 = arith.constant 0 : index
    %18 = vector.load %arg6[%c0_12, %c0_13, %c0_14] : memref<1x1x256xf32, #tpu.memory_space<vmem>>, vector<1x1x256xf32>
    %19 = vector.shape_cast %18 : vector<1x1x256xf32> to vector<1x256xf32>
    %20 = vector.shape_cast %17 : vector<1x256xf32> to vector<1x1x256xf32>
    tpu.vector_store %arg6[%c0_12, %c0_13, %c0_14], %20 {strides = array<i32>} : memref<1x1x256xf32, #tpu.memory_space<vmem>>, vector<1x1x256xf32>,
    return
  }
  func.func @transform_0(%arg0: i32) -> (i32, i32) {
    %c0_i32 = arith.constant 0 : i32
    %c0_i32_0 = arith.constant 0 : i32
    return %arg0, %c0_i32 : i32, i32
  }
  func.func @transform_1(%arg0: i32) -> (i32, i32) {
    %c0_i32 = arith.constant 0 : i32
    %c0_i32_0 = arith.constant 0 : i32
    %c0_i32_1 = arith.constant 0 : i32
    return %c0_i32, %c0_i32_0 : i32, i32
  }
  func.func @transform_2(%arg0: i32) -> (i32, i32) {
    %c0_i32 = arith.constant 0 : i32
    %c0_i32_0 = arith.constant 0 : i32
    %c0_i32_1 = arith.constant 0 : i32
    return %c0_i32, %c0_i32_0 : i32, i32
  }
  func.func @transform_3(%arg0: i32) -> (i32, i32) {
    %c0_i32 = arith.constant 0 : i32
    %c0_i32_0 = arith.constant 0 : i32
    %c0_i32_1 = arith.constant 0 : i32
    return %c0_i32, %c0_i32_0 : i32, i32
  }
  func.func @transform_4(%arg0: i32) -> (i32, i32) {
    %c0_i32 = arith.constant 0 : i32
    %c0_i32_0 = arith.constant 0 : i32
    return %arg0, %c0_i32 : i32, i32
  }
  func.func @transform_5(%arg0: i32) -> (i32, i32, i32) {
    %c0_i32 = arith.constant 0 : i32
    %c0_i32_0 = arith.constant 0 : i32
    %c0_i32_1 = arith.constant 0 : i32
    return %arg0, %c0_i32, %c0_i32_0 : i32, i32, i32
  }
}

module attributes {stable_mosaic.version = 11 : i64} {
  func.func @_bn_relu_kernel(%arg0: i32, %arg1: memref<16x128xf32, #tpu.memory_space<vmem>>, %arg2: memref<1x128xf32, #tpu.memory_space<vmem>>, %arg3: memref<1x128xf32, #tpu.memory_space<vmem>>, %arg4: memref<16x128xf32, #tpu.memory_space<vmem>>) attributes {dimension_semantics = [#tpu.dimension_semantics<parallel>], iteration_bounds = array<i64: 2>, scalar_prefetch = 0 : i64, scratch_operands = 0 : i64, tpu.core_type = #tpu.core_type<tc>, window_params = [{transform_indices = @transform_0, window_bounds = array<i64: 16, 128>}, {pipeline_mode = #tpu.pipeline_mode<synchronous>, transform_indices = @transform_1, window_bounds = array<i64: 1, 128>}, {pipeline_mode = #tpu.pipeline_mode<synchronous>, transform_indices = @transform_2, window_bounds = array<i64: 1, 128>}, {transform_indices = @transform_3, window_bounds = array<i64: 16, 128>}]} {
    %c0 = arith.constant 0 : index
    %c0_0 = arith.constant 0 : index
    %0 = vector.load %arg1[%c0, %c0_0] : memref<16x128xf32, #tpu.memory_space<vmem>>, vector<16x128xf32>
    %c0_1 = arith.constant 0 : index
    %c0_2 = arith.constant 0 : index
    %1 = vector.load %arg2[%c0_1, %c0_2] : memref<1x128xf32, #tpu.memory_space<vmem>>, vector<1x128xf32>
    %2 = vector.broadcast %1 : vector<1x128xf32> to vector<16x128xf32>
    %3 = arith.mulf %0, %2 : vector<16x128xf32>
    %c0_3 = arith.constant 0 : index
    %c0_4 = arith.constant 0 : index
    %4 = vector.load %arg3[%c0_3, %c0_4] : memref<1x128xf32, #tpu.memory_space<vmem>>, vector<1x128xf32>
    %5 = vector.broadcast %4 : vector<1x128xf32> to vector<16x128xf32>
    %6 = arith.addf %3, %5 : vector<16x128xf32>
    %cst = arith.constant 0.000000e+00 : f32
    %7 = vector.broadcast %cst : f32 to vector<16x128xf32>
    %8 = arith.maximumf %6, %7 : vector<16x128xf32>
    %c0_5 = arith.constant 0 : index
    %c0_6 = arith.constant 0 : index
    %9 = vector.load %arg4[%c0_5, %c0_6] : memref<16x128xf32, #tpu.memory_space<vmem>>, vector<16x128xf32>
    tpu.vector_store %arg4[%c0_5, %c0_6], %8 {strides = array<i32>} : memref<16x128xf32, #tpu.memory_space<vmem>>, vector<16x128xf32>,
    return
  }
  func.func @transform_0(%arg0: i32) -> (i32, i32) {
    %c0_i32 = arith.constant 0 : i32
    %c0_i32_0 = arith.constant 0 : i32
    return %arg0, %c0_i32 : i32, i32
  }
  func.func @transform_1(%arg0: i32) -> (i32, i32) {
    %c0_i32 = arith.constant 0 : i32
    %c0_i32_0 = arith.constant 0 : i32
    %c0_i32_1 = arith.constant 0 : i32
    return %c0_i32, %c0_i32_0 : i32, i32
  }
  func.func @transform_2(%arg0: i32) -> (i32, i32) {
    %c0_i32 = arith.constant 0 : i32
    %c0_i32_0 = arith.constant 0 : i32
    %c0_i32_1 = arith.constant 0 : i32
    return %c0_i32, %c0_i32_0 : i32, i32
  }
  func.func @transform_3(%arg0: i32) -> (i32, i32) {
    %c0_i32 = arith.constant 0 : i32
    %c0_i32_0 = arith.constant 0 : i32
    return %arg0, %c0_i32 : i32, i32
  }
}

</mosaic_0001>

<bundles_post_ra>
// kernel: tile.33
= control target key start
LH: loop header
LB: loop body
LE: loop exit
PB: predicated region body
PF: predicated region fallthrough
CT: control target
= control target key end

     0   :  { %s28_s0 = inlined_call_operand.vmem [shape: f32[4], index: 0, kind: input, shape index: {}]   ;;  %s29_s1 = inlined_call_operand.vmem [shape: f32[16,4], index: 1, kind: output, shape index: {}]  }
   0x1   :  { %v4_v0 = vld [vmem:[%s28_s0] ss:$0 sm:$0xff] }
   0x2   :  { %5 = vst [vmem:[%s29_s1] sm:$0xff] %v4_v0  ;;  %8 = vst [vmem:[%s29_s1 + $0x8] sm:$0xff] %v4_v0 }

// kernel: tile.34
= control target key start
LH: loop header
LB: loop body
LE: loop exit
PB: predicated region body
PF: predicated region fallthrough
CT: control target
= control target key end

     0   :  { %s131_s10 = smov 60   ;;  %s132_s11 = smov 52   ;;  %vm3_vm0 = vcmask 31744   ;;  %vm9_vm1 = vcmask 523744   ;;  %vm15_vm2 = vcmask 490944   ;;  %vm21_vm3 = vcmask 458144   ;;  %s207_s0 = inlined_call_operand.vmem [shape: f32[16,4], index: 0, kind: input, shape index: {}]   ;;  %s208_s1 = inlined_call_operand.vmem [shape: f32[1,64], index: 1, kind: output, shape index: {}]  }
   0x1   :  { %v101_v0 = vld [vmem:[%s207_s0 + $0xf] sm:$0x1]   ;;  %v103_v1 = vld [vmem:[%s207_s0 + $0xd] sm:$0x1]   ;;  %v102_v2 = vld [vmem:[%s207_s0 + $0xe] sm:$0x1]  }
   0x2   :  { %7 = vrot.lane.b32.xlu0 %v101_v0, %s131_s10  ;;  %19 = vrot.lane.b32.xlu1 %v103_v1, %s132_s11  ;;  %v104_v3 = vld [vmem:[%s207_s0 + $0xc] sm:$0x1]   ;;  %s133_s16 = smov 56   ;;  %s134_s17 = smov 48   ;;  %v105_v4 = vld [vmem:[%s207_s0 + $0xb] sm:$0x1]  }
   0x3   :  { %v106_v5 = vld [vmem:[%s207_s0 + $0xa] sm:$0x1]   ;;  %v2_v6 = vld [vmem:[%s207_s0] sm:$0x1]   ;;  %s135_s24 = smov 44   ;;  %s136_s25 = smov 40  }
   0x4   :  { %4 = vst.msk [vmem:[#allocation0] sm:$0x1] %vm3_vm0, %v2_v6   ;;  %v107_v7 = vld [vmem:[%s207_s0 + $0x9] sm:$0x1]   ;;  %v108_v8 = vld [vmem:[%s207_s0 + $0x8] sm:$0x1]  }
   0x5   :  { %s137_s30 = smov 36   ;;  %s138_s2 = smov 32   ;;  %v109_v9 = vld [vmem:[%s207_s0 + $0x7] sm:$0x1]   ;;  %v110_v10 = vld [vmem:[%s207_s0 + $0x6] sm:$0x1]  }
   0x6   :  { %13 = vrot.lane.b32.xlu0 %v102_v2, %s133_s16  ;;  %25 = vrot.lane.b32.xlu1 %v104_v3, %s134_s17  ;;  %s139_s7 = smov 28   ;;  %s140_s8 = smov 24   ;;  %v111_v11 = vld [vmem:[%s207_s0 + $0x5] sm:$0x1]   ;;  %v112_v12 = vld [vmem:[%s207_s0 + $0x4] sm:$0x1]  }
   0x7   :  { %s141_s13 = smov 20   ;;  %s142_s14 = smov 16   ;;  %v113_v13 = vld [vmem:[%s207_s0 + $0x3] sm:$0x1]   ;;  %v114_v14 = vld [vmem:[%s207_s0 + $0x2] sm:$0x1]  }
   0x8   :  { %s143_s19 = smov 12   ;;  %s144_s20 = smov 8   ;;  %v115_v15 = vld [vmem:[%s207_s0 + $0x1] sm:$0x1]   ;;  %vm27_vm4 = vcmask 425344   ;;  %vm33_vm5 = vcmask 392544  }
   0x9   :  { %s145_s0 = smov 4   ;;  %vm39_vm6 = vcmask 359744   ;;  %vm45_vm7 = vcmask 326944   ;;  %vm51_vm8 = vcmask 294144   ;;  %vm57_vm9 = vcmask 261344  }
   0xa   :  { %31 = vrot.lane.b32.xlu0 %v105_v4, %s135_s24  ;;  %37 = vrot.lane.b32.xlu1 %v106_v5, %s136_s25  ;;  %vm63_vm10 = vcmask 228544   ;;  %vm69_vm11 = vcmask 195744   ;;  %vm75_vm12 = vcmask 162944   ;;  %vm81_vm13 = vcmask 130144  }
   0xb   :  { %vm87_vm14 = vcmask 97344   ;;  %vm93_vm15 = vcmask 64544  }
   0xe   :  { %43 = vrot.lane.b32.xlu0 %v107_v7, %s137_s30  ;;  %49 = vrot.lane.b32.xlu1 %v108_v8, %s138_s2 }
  0x12   :  { %55 = vrot.lane.b32.xlu0 %v109_v9, %s139_s7  ;;  %61 = vrot.lane.b32.xlu1 %v110_v10, %s140_s8 }
  0x16   :  { %67 = vrot.lane.b32.xlu0 %v111_v11, %s141_s13  ;;  %73 = vrot.lane.b32.xlu1 %v112_v12, %s142_s14 }
  0x1a   :  { %79 = vrot.lane.b32.xlu0 %v113_v13, %s143_s19  ;;  %85 = vrot.lane.b32.xlu1 %v114_v14, %s144_s20 }
  0x1e   :  { %91 = vrot.lane.b32.xlu0 %v115_v15, %s145_s0 }
  0x74   :  { %v8_v16 = vpop.permute.xlu0 %7   ;;  %v20_v17 = vpop.permute.xlu1 %19  }
  0x75   :  { %10 = vst.msk [vmem:[#allocation0] sm:$0x1] %vm9_vm1, %v8_v16  }
  0x78   :  { %v14_v18 = vpop.permute.xlu0 %13   ;;  %v26_v19 = vpop.permute.xlu1 %25  }
  0x79   :  { %16 = vst.msk [vmem:[#allocation0] sm:$0x1] %vm15_vm2, %v14_v18  }
  0x7a   :  { %22 = vst.msk [vmem:[#allocation0] sm:$0x1] %vm21_vm3, %v20_v17  }
  0x7b   :  { %28 = vst.msk [vmem:[#allocation0] sm:$0x1] %vm27_vm4, %v26_v19  }
  0x7c   :  { %v32_v20 = vpop.permute.xlu0 %31   ;;  %v38_v21 = vpop.permute.xlu1 %37  }
  0x7d   :  { %34 = vst.msk [vmem:[#allocation0] sm:$0x1] %vm33_vm5, %v32_v20  }
  0x7e   :  { %40 = vst.msk [vmem:[#allocation0] sm:$0x1] %vm39_vm6, %v38_v21  }
  0x80   :  { %v44_v22 = vpop.permute.xlu0 %43   ;;  %v50_v23 = vpop.permute.xlu1 %49  }
  0x81   :  { %46 = vst.msk [vmem:[#allocation0] sm:$0x1] %vm45_vm7, %v44_v22  }
  0x82   :  { %52 = vst.msk [vmem:[#allocation0] sm:$0x1] %vm51_vm8, %v50_v23  }
  0x84   :  { %v56_v24 = vpop.permute.xlu0 %55   ;;  %v62_v25 = vpop.permute.xlu1 %61  }
  0x85   :  { %58 = vst.msk [vmem:[#allocation0] sm:$0x1] %vm57_vm9, %v56_v24  }
  0x86   :  { %64 = vst.msk [vmem:[#allocation0] sm:$0x1] %vm63_vm10, %v62_v25  }
  0x88   :  { %v68_v26 = vpop.permute.xlu0 %67   ;;  %v74_v27 = vpop.permute.xlu1 %73  }
  0x89   :  { %70 = vst.msk [vmem:[#allocation0] sm:$0x1] %vm69_vm11, %v68_v26  }
  0x8a   :  { %76 = vst.msk [vmem:[#allocation0] sm:$0x1] %vm75_vm12, %v74_v27  }
  0x8c   :  { %v80_v28 = vpop.permute.xlu0 %79   ;;  %v86_v29 = vpop.permute.xlu1 %85  }
  0x8d   :  { %82 = vst.msk [vmem:[#allocation0] sm:$0x1] %vm81_vm13, %v80_v28  }
  0x8e   :  { %88 = vst.msk [vmem:[#allocation0] sm:$0x1] %vm87_vm14, %v86_v29  }
  0x90   :  { %v92_v30 = vpop.permute.xlu0 %91  }
  0x91   :  { %94 = vst.msk [vmem:[#allocation0] sm:$0x1] %vm93_vm15, %v92_v30  }
  0x98   :  { %v98_v31 = vld [vmem:[#allocation0] sm:$0x1] }
  0x99   :  { %100 = vst [vmem:[%s208_s1] sm:$0x1] %v98_v31 }

// kernel: tile.43
= control target key start
LH: loop header
LB: loop body
LE: loop exit
PB: predicated region body
PF: predicated region fallthrough
CT: control target
= control target key end

     0   :  { %s28_s0 = inlined_call_operand.vmem [shape: f32[8], index: 0, kind: input, shape index: {}]   ;;  %s29_s1 = inlined_call_operand.vmem [shape: f32[16,8], index: 1, kind: output, shape index: {}]  }
   0x1   :  { %v4_v0 = vld [vmem:[%s28_s0] ss:$0 sm:$0xff] }
   0x2   :  { %5 = vst [vmem:[%s29_s1] sm:$0xff] %v4_v0  ;;  %8 = vst [vmem:[%s29_s1 + $0x8] sm:$0xff] %v4_v0 }

// kernel: tile.44
= control target key start
LH: loop header
LB: loop body
LE: loop exit
PB: predicated region body
PF: predicated region fallthrough
CT: control target
= control target key end

     0   :  { %s131_s10 = smov 120   ;;  %s132_s11 = smov 104   ;;  %vm3_vm0 = vcmask 64512   ;;  %vm9_vm1 = vcmask 1048512   ;;  %vm15_vm2 = vcmask 982912   ;;  %vm21_vm3 = vcmask 917312   ;;  %s207_s0 = inlined_call_operand.vmem [shape: f32[16,8], index: 0, kind: input, shape index: {}]   ;;  %s208_s1 = inlined_call_operand.vmem [shape: f32[1,128], index: 1, kind: output, shape index: {}]  }
   0x1   :  { %v101_v0 = vld [vmem:[%s207_s0 + $0xf] sm:$0x1]   ;;  %v103_v1 = vld [vmem:[%s207_s0 + $0xd] sm:$0x1]   ;;  %v102_v2 = vld [vmem:[%s207_s0 + $0xe] sm:$0x1]  }
   0x2   :  { %7 = vrot.lane.b32.xlu0 %v101_v0, %s131_s10  ;;  %19 = vrot.lane.b32.xlu1 %v103_v1, %s132_s11  ;;  %v104_v3 = vld [vmem:[%s207_s0 + $0xc] sm:$0x1]   ;;  %s133_s16 = smov 112   ;;  %s134_s17 = smov 96   ;;  %v105_v4 = vld [vmem:[%s207_s0 + $0xb] sm:$0x1]  }
   0x3   :  { %v106_v5 = vld [vmem:[%s207_s0 + $0xa] sm:$0x1]   ;;  %v2_v6 = vld [vmem:[%s207_s0] sm:$0x1]   ;;  %s135_s24 = smov 88   ;;  %s136_s25 = smov 80  }
   0x4   :  { %4 = vst.msk [vmem:[#allocation0] sm:$0x1] %vm3_vm0, %v2_v6   ;;  %v107_v7 = vld [vmem:[%s207_s0 + $0x9] sm:$0x1]   ;;  %v108_v8 = vld [vmem:[%s207_s0 + $0x8] sm:$0x1]  }
   0x5   :  { %s137_s30 = smov 72   ;;  %s138_s2 = smov 64   ;;  %v109_v9 = vld [vmem:[%s207_s0 + $0x7] sm:$0x1]   ;;  %v110_v10 = vld [vmem:[%s207_s0 + $0x6] sm:$0x1]  }
   0x6   :  { %13 = vrot.lane.b32.xlu0 %v102_v2, %s133_s16  ;;  %25 = vrot.lane.b32.xlu1 %v104_v3, %s134_s17  ;;  %s139_s7 = smov 56   ;;  %s140_s8 = smov 48   ;;  %v111_v11 = vld [vmem:[%s207_s0 + $0x5] sm:$0x1]   ;;  %v112_v12 = vld [vmem:[%s207_s0 + $0x4] sm:$0x1]  }
   0x7   :  { %s141_s13 = smov 40   ;;  %s142_s14 = smov 32   ;;  %v113_v13 = vld [vmem:[%s207_s0 + $0x3] sm:$0x1]   ;;  %v114_v14 = vld [vmem:[%s207_s0 + $0x2] sm:$0x1]  }
   0x8   :  { %s143_s19 = smov 24   ;;  %s144_s20 = smov 16   ;;  %v115_v15 = vld [vmem:[%s207_s0 + $0x1] sm:$0x1]   ;;  %vm27_vm4 = vcmask 851712   ;;  %vm33_vm5 = vcmask 786112  }
   0x9   :  { %s145_s0 = smov 8   ;;  %vm39_vm6 = vcmask 720512   ;;  %vm45_vm7 = vcmask 654912   ;;  %vm51_vm8 = vcmask 589312   ;;  %vm57_vm9 = vcmask 523712  }
   0xa   :  { %31 = vrot.lane.b32.xlu0 %v105_v4, %s135_s24  ;;  %37 = vrot.lane.b32.xlu1 %v106_v5, %s136_s25  ;;  %vm63_vm10 = vcmask 458112   ;;  %vm69_vm11 = vcmask 392512   ;;  %vm75_vm12 = vcmask 326912   ;;  %vm81_vm13 = vcmask 261312  }
   0xb   :  { %vm87_vm14 = vcmask 195712   ;;  %vm93_vm15 = vcmask 130112  }
   0xe   :  { %43 = vrot.lane.b32.xlu0 %v107_v7, %s137_s30  ;;  %49 = vrot.lane.b32.xlu1 %v108_v8, %s138_s2 }
  0x12   :  { %55 = vrot.lane.b32.xlu0 %v109_v9, %s139_s7  ;;  %61 = vrot.lane.b32.xlu1 %v110_v10, %s140_s8 }
  0x16   :  { %67 = vrot.lane.b32.xlu0 %v111_v11, %s141_s13  ;;  %73 = vrot.lane.b32.xlu1 %v112_v12, %s142_s14 }
  0x1a   :  { %79 = vrot.lane.b32.xlu0 %v113_v13, %s143_s19  ;;  %85 = vrot.lane.b32.xlu1 %v114_v14, %s144_s20 }
  0x1e   :  { %91 = vrot.lane.b32.xlu0 %v115_v15, %s145_s0 }
  0x74   :  { %v8_v16 = vpop.permute.xlu0 %7   ;;  %v20_v17 = vpop.permute.xlu1 %19  }
  0x75   :  { %10 = vst.msk [vmem:[#allocation0] sm:$0x1] %vm9_vm1, %v8_v16  }
  0x78   :  { %v14_v18 = vpop.permute.xlu0 %13   ;;  %v26_v19 = vpop.permute.xlu1 %25  }
  0x79   :  { %16 = vst.msk [vmem:[#allocation0] sm:$0x1] %vm15_vm2, %v14_v18  }
  0x7a   :  { %22 = vst.msk [vmem:[#allocation0] sm:$0x1] %vm21_vm3, %v20_v17  }
  0x7b   :  { %28 = vst.msk [vmem:[#allocation0] sm:$0x1] %vm27_vm4, %v26_v19  }
  0x7c   :  { %v32_v20 = vpop.permute.xlu0 %31   ;;  %v38_v21 = vpop.permute.xlu1 %37  }
  0x7d   :  { %34 = vst.msk [vmem:[#allocation0] sm:$0x1] %vm33_vm5, %v32_v20  }
  0x7e   :  { %40 = vst.msk [vmem:[#allocation0] sm:$0x1] %vm39_vm6, %v38_v21  }
  0x80   :  { %v44_v22 = vpop.permute.xlu0 %43   ;;  %v50_v23 = vpop.permute.xlu1 %49  }
  0x81   :  { %46 = vst.msk [vmem:[#allocation0] sm:$0x1] %vm45_vm7, %v44_v22  }
  0x82   :  { %52 = vst.msk [vmem:[#allocation0] sm:$0x1] %vm51_vm8, %v50_v23  }
  0x84   :  { %v56_v24 = vpop.permute.xlu0 %55   ;;  %v62_v25 = vpop.permute.xlu1 %61  }
  0x85   :  { %58 = vst.msk [vmem:[#allocation0] sm:$0x1] %vm57_vm9, %v56_v24  }
  0x86   :  { %64 = vst.msk [vmem:[#allocation0] sm:$0x1] %vm63_vm10, %v62_v25  }
  0x88   :  { %v68_v26 = vpop.permute.xlu0 %67   ;;  %v74_v27 = vpop.permute.xlu1 %73  }
  0x89   :  { %70 = vst.msk [vmem:[#allocation0] sm:$0x1] %vm69_vm11, %v68_v26  }
  0x8a   :  { %76 = vst.msk [vmem:[#allocation0] sm:$0x1] %vm75_vm12, %v74_v27  }
  0x8c   :  { %v80_v28 = vpop.permute.xlu0 %79   ;;  %v86_v29 = vpop.permute.xlu1 %85  }
  0x8d   :  { %82 = vst.msk [vmem:[#allocation0] sm:$0x1] %vm81_vm13, %v80_v28  }
  0x8e   :  { %88 = vst.msk [vmem:[#allocation0] sm:$0x1] %vm87_vm14, %v86_v29  }
  0x90   :  { %v92_v30 = vpop.permute.xlu0 %91  }
  0x91   :  { %94 = vst.msk [vmem:[#allocation0] sm:$0x1] %vm93_vm15, %v92_v30  }
  0x98   :  { %v98_v31 = vld [vmem:[#allocation0] sm:$0x1] }
  0x99   :  { %100 = vst [vmem:[%s208_s1] sm:$0x1] %v98_v31 }

// kernel: depth_separable_convolution.4
= control target key start
LH: loop header
LB: loop body
LE: loop exit
PB: predicated region body
PF: predicated region fallthrough
CT: control target
= control target key end

     0   :  { %s588_s18 = smov 0   ;;  %s643_s0 = inlined_call_operand.vmem [shape: f32[32,64], index: 0, kind: input, shape index: {}]   ;;  %s644_s1 = inlined_call_operand.vmem [shape: f32[1,64], index: 1, kind: input, shape index: {}]   ;;  %s645_s2 = inlined_call_operand.vmem [shape: f32[1,64], index: 2, kind: input, shape index: {}]   ;;  %s646_s3 = inlined_call_operand.vmem [shape: f32[64,128], index: 3, kind: input, shape index: {}]   ;;  %s647_s4 = inlined_call_operand.vmem [shape: f32[32,128], index: 4, kind: output, shape index: {0}]   ;;  %s648_s5 = inlined_call_operand.vmem [shape: f32[2,1,256], index: 5, kind: output, shape index: {1}]  }
   0x1 LB: > { %s594_s19 = sadd.s32 4294967295, %s555_s18   ;;  %p483_p0 = scmp.ge.s32.totalorder %s555_s18, 1  ;;  %s555_s18 = sphi %s588_s18, %s16_s18  }
   0x2   : > { %p191_p1 = scmp.lt.s32.totalorder %s555_s18, 3 }
   0x4   : > { %p192_p2 = pnand %p483_p0, %p191_p1 }
   0x5   : > { %v261_v0 = vld [vmem:[%s646_s3] sm:$0xff] (!%p192_p2)  ;;  %v262_v1 = vld [vmem:[%s646_s3 + $0x8] sm:$0xff] (!%p192_p2)  ;;  %v263_v2 = vld [vmem:[%s646_s3 + $0x10] sm:$0xff] (!%p192_p2)  ;;  %s484_s26 = sshll.u32 (!%p192_p2), %s594_s19, 1  ;;  %vm269_vm0 = vcmask (!%p192_p2), 523264   ;;  %v375_v35 = vlaneseq (!%p192_p2)  ;;  %p235_p4 = scmp.lt.s32.totalorder (!%p192_p2), %s594_s19, 1 }
   0x6   : > { %195 = sbr.rel (%p192_p2) target bundleno = 260 (0x104), region = 36  ;;  %v524_v3 = vpack.c.bf16 (!%p192_p2), %v262_v1, %v261_v0  ;;  %v264_v4 = vld [vmem:[%s646_s3 + $0x18] sm:$0xff] (!%p192_p2)  ;;  %p224_p3 = scmp.lt.s32.totalorder (!%p192_p2), %s484_s26, 3  ;;  %v265_v6 = vld [vmem:[%s646_s3 + $0x20] sm:$0xff] (!%p192_p2)  ;;  %v266_v7 = vld [vmem:[%s646_s3 + $0x28] sm:$0xff] (!%p192_p2) }
   0x7   : > { %v528_v5 = vpack.c.bf16 (!%p192_p2), %v264_v4, %v263_v2  ;;  %v532_v8 = vpack.c.bf16 (!%p192_p2), %v266_v7, %v265_v6  ;;  %v489_v9 = vld [vmem:[%s644_s1] ss:$0 sm:$0xff] (!%p192_p2)  ;;  %v267_v10 = vld [vmem:[%s646_s3 + $0x30] sm:$0xff] (!%p192_p2)  ;;  %v268_v11 = vld [vmem:[%s646_s3 + $0x38] sm:$0xff] (!%p192_p2)  ;;  %v557_v33 = vmov (!%p192_p2), 1966171168  }
   0x8   : > { %525 = vmatprep.subr.bf16.mxu0 (!%p192_p2), %v524_v3  ;;  %v490_v14 = vld [vmem:[%s645_s2] ss:$0 sm:$0xff] (!%p192_p2)  ;;  %v536_v17 = vpack.c.bf16 (!%p192_p2), %v268_v11, %v267_v10  ;;  %v373_v34 = vunpack.c.l.s4 (!%p192_p2), %v557_v33  ;;  %v376_v41 = vshrl.u32 (!%p192_p2), %v375_v35, 7  ;;  %vm389_vm1 = vcmp.lt.s32.totalorder (!%p192_p2), %v375_v35, 256 }
   0x9   : > { %527 = vmatpush3.bf16.msra.mxu0 (!%p192_p2), %v524_v3 }
   0xa   : > { %529 = vmatprep.subr.bf16.mxu0 (!%p192_p2), %v528_v5  ;;  %v374_v40 = vunpack.c.0.s8 (!%p192_p2), %v373_v34 }
   0xc   : > { %v377_v45 = vsub.s32 (!%p192_p2), %v374_v40, %v376_v41 }
   0xd   : > { %s650_s26 = smov (!%p224_p3, %s484_s26), 3  ;;  %531 = vmatpush3.bf16.msra.mxu0 %v528_v5  ;;  %s652_s19 = smov (!%p235_p4, %s594_s19), 1 }
   0xe   : > { %s485_s8 = sshll.u32 %s650_s26, 3  ;;  %533 = vmatprep.subr.bf16.mxu0 %v532_v8  ;;  %s488_s25 = sshll.u32 %s652_s19, 1 }
   0xf   : > { %s227_s17 = scalar_lea.vmem %s643_s0, %s485_s8  ;;  %s233_s24 = scalar_lea.vmem %s647_s4, %s485_s8 }
  0x10   : > { %v239_v12 = vld [vmem:[%s227_s17] sm:$0xff]  ;;  %v240_v13 = vld [vmem:[%s227_s17 + $0x8] sm:$0xff]  ;;  %s238_s28 = scalar_lea.vmem %s648_s5, %s488_s25 }
  0x11   : > { %v248_v15 = vmul.f32 %v489_v9, %v239_v12  ;;  %v249_v16 = vmul.f32 %v489_v9, %v240_v13  ;;  %535 = vmatpush3.bf16.msra.mxu0 %v532_v8 }
  0x12   : > { %537 = vmatprep.subr.bf16.mxu0 %v536_v17 }
  0x13   : > { %v257_v18 = vadd.f32 %v490_v14, %v248_v15  ;;  %v258_v19 = vadd.f32 %v490_v14, %v249_v16 }
  0x15   : > { %v259_v20 = vmax.f32 %v257_v18, 0.0  ;;  %v260_v21 = vmax.f32 %v258_v19, 0.0  ;;  %539 = vmatpush3.bf16.msra.mxu0 %v536_v17 }
  0x17   : > { %521 = vmatprep.mubr.msk.f32.mxu0 %vm269_vm0, %v259_v20 }
  0x18   : > { %522 = vmatmul.mubr.msk.f32.vlgmr.msra.gmra.mrb[0].mxu0 %vm269_vm0, %v260_v21 }
  0xeb   : > { %v523_v22 = vpop.f32.mrb[0].mxu0 }
  0xec   : > { %v361_v23 = vmul.f32 %v523_v22, %v523_v22  ;;  %v342_v24 = vpop.f32.mrb[1].mxu0  ;;  %352 = vst [vmem:[%s233_s24 + $0x8] sm:$0xff] %v523_v22 }
  0xed   : > { %351 = vst [vmem:[%s233_s24] sm:$0xff] %v342_v24  ;;  %v353_v25 = vadd.f32 %v523_v22, %v342_v24  ;;  %v360_v26 = vmul.f32 %v342_v24, %v342_v24 }
  0xef   : > { %v354_v27 = vrot.slane %v353_v25, 4  ;;  %v362_v28 = vadd.f32 %v361_v23, %v360_v26 }
  0xf1   : > { %v355_v29 = vadd.f32 %v354_v27, %v353_v25  ;;  %v363_v30 = vrot.slane %v362_v28, 4 }
  0xf3   : > { %v356_v31 = vrot.slane %v355_v29, 2  ;;  %v364_v32 = vadd.f32 %v363_v30, %v362_v28 }
  0xf5   : > { %v357_v36 = vadd.f32 %v356_v31, %v355_v29  ;;  %v365_v37 = vrot.slane %v364_v32, 2 }
  0xf7   : > { %v358_v38 = vrot.slane %v357_v36, 1  ;;  %v366_v39 = vadd.f32 %v365_v37, %v364_v32 }
  0xf9   : > { %v367_v42 = vrot.slane %v366_v39, 1  ;;  %v359_v43 = vadd.f32 %v358_v38, %v357_v36 }
  0xfb   : > { %v368_v44 = vadd.f32 %v367_v42, %v366_v39 }
  0xfd   : > { %v371_v46 = vcombine.low %v359_v43, %v368_v44 }
  0xff   : > { %v378_v47 = vrot.slane %v371_v46, %v377_v45 }
 0x101   : > { %v385_v48 = vrot.slane %v378_v47, %v377_v45 }
 0x103   : > { %391 = vst.msk [vmem:[%s238_s28] sm:$0x3] %vm389_vm1, %v385_v48 }
 0x104 PF: > { %s16_s18 = sadd.s32 1, %s555_s18  }
 0x105   : > { %p13_p5 = scmp.ge.s32.totalorder %s16_s18, 4  }
 0x107   :  { %15 = sbr.rel (!%p13_p5) target bundleno = 1 (0x1), region = 78 }

// kernel: depth_separable_convolution.3
= control target key start
LH: loop header
LB: loop body
LE: loop exit
PB: predicated region body
PF: predicated region fallthrough
CT: control target
= control target key end

     0   :  { %s641_s12 = smov 0   ;;  %s765_s0 = inlined_call_operand.vmem [shape: f32[2,18,72], index: 0, kind: input, shape index: {}]   ;;  %s766_s1 = inlined_call_operand.vmem [shape: f32[3,3,1,64], index: 1, kind: input, shape index: {}]   ;;  %s767_s2 = inlined_call_operand.vmem [shape: f32[2,16,64], index: 2, kind: output, shape index: {0}]   ;;  %s768_s3 = inlined_call_operand.vmem [shape: f32[2,1,128], index: 3, kind: output, shape index: {1}]  }
   0x1 LB: > { %s568_s13 = sadd.s32 4294967295, %s615_s12   ;;  %p572_p0 = scmp.ge.s32.totalorder %s615_s12, 1  ;;  %s615_s12 = sphi %s641_s12, %s14_s12  }
   0x2   : > { %p140_p1 = scmp.lt.s32.totalorder %s615_s12, 3 }
   0x4   : > { %p141_p2 = pnand %p572_p0, %p140_p1 }
   0x5   : > { %v582_v0 = vld [vmem:[%s766_s1 + $0x2] ss:$0 sm:$0xff] (!%p141_p2)  ;;  %s617_s16 = smov (!%p141_p2), 8   ;;  %v592_v1 = vld [vmem:[%s766_s1 + $0x8] ss:$0 sm:$0xff] (!%p141_p2)  ;;  %p167_p3 = scmp.lt.s32.totalorder (!%p141_p2), %s568_s13, 1 }
   0x6   : > { %144 = sbr.rel (%p141_p2) target bundleno = 404 (0x194), region = 28  ;;  %253 = vrot.lane.b32.xlu0 (!%p141_p2), %v582_v0, %s617_s16  ;;  %v586_v2 = vld [vmem:[%s766_s1 + $0x5] ss:$0 sm:$0xff] (!%p141_p2)  ;;  %395 = vrot.lane.b32.xlu1 (!%p141_p2), %v592_v1, %s617_s16  ;;  %v580_v3 = vld [vmem:[%s766_s1 + $0x1] ss:$0 sm:$0xff] (!%p141_p2)  ;;  %s618_s24 = smov (!%p141_p2), 4  }
   0x7   : > { %v578_v4 = vld [vmem:[%s766_s1] ss:$0 sm:$0xff] (!%p141_p2)  ;;  %v577_v5 = vld [vmem:[%s766_s1 + $0x4] ss:$0 sm:$0xff] (!%p141_p2)  ;;  %vm207_vm0 = vcmask (!%p141_p2), 1040384   ;;  %s619_s11 = smov (!%p141_p2), 124  }
   0x8   : > { %v584_v12 = vld [vmem:[%s766_s1 + $0x3] ss:$0 sm:$0xff] (!%p141_p2)  ;;  %v590_v17 = vld [vmem:[%s766_s1 + $0x7] ss:$0 sm:$0xff] (!%p141_p2)  ;;  %v588_v21 = vld [vmem:[%s766_s1 + $0x6] ss:$0 sm:$0xff] (!%p141_p2) }
   0x9   : > { %vm343_vm1 = vcmask (!%p141_p2), 1046528   ;;  %vm446_vm2 = vcmask (!%p141_p2), 556064   ;;  %s620_s14 = smov (!%p141_p2), 60   ;;  %vm433_vm3 = vcmask (!%p141_p2), 523265   ;;  %vm435_vm4 = vcmask (!%p141_p2), 523264  }
   0xa   : > { %308 = vrot.lane.b32.xlu0 (!%p141_p2), %v586_v2, %s617_s16  ;;  %230 = vrot.lane.b32.xlu1 (!%p141_p2), %v580_v3, %s618_s24  ;;  %vm437_vm5 = vcmask (!%p141_p2), 516096  }
   0xd   : > { %s770_s13 = smov (!%p167_p3, %s568_s13), 1 }
   0xe   : > { %s596_s23 = smul.u32 24, %s770_s13  ;;  %190 = vrot.lane.b32.xlu0 %v577_v5, %s618_s24  ;;  %s595_s15 = sshll.u32 %s770_s13, 4 }
   0xf   : > { %s176_s18 = scalar_lea.vmem %s767_s2, %s595_s15  ;;  %s179_s21 = scalar_lea.vmem %s768_s3, %s770_s13 }
  0x10   : > { %s171_s4 = scalar_lea.vmem %s765_s0, %s596_s23 }
  0x11   : > { %v674_v6 = vld [vmem:[%s171_s4] sm:$0xff]  ;;  %v676_v7 = vld [vmem:[%s171_s4 + $0x8] sm:$0xff]  ;;  %v691_v16 = vld [vmem:[%s171_s4 + $0x10] sm:$0x3] }
  0x12   : > { %v203_v8 = vmul.f32 %v578_v4, %v674_v6  ;;  %v204_v9 = vmul.f32 %v578_v4, %v676_v7  ;;  %v284_v14 = vmul.f32 %v584_v12, %v676_v7  ;;  %v283_v15 = vmul.f32 %v584_v12, %v674_v6 }
  0x13   : > { %v285_v18 = vmul.f32 %v584_v12, %v691_v16  ;;  %v338_v26 = vmul.f32 %v588_v21, %v676_v7  ;;  %v339_v27 = vmul.f32 %v588_v21, %v691_v16  ;;  %v337_v28 = vmul.f32 %v588_v21, %v674_v6 }
  0x14   : > { %v208_v10 = vrot.slane %v203_v8, 7  ;;  %v209_v11 = vrot.slane %v204_v9, 7 }
  0x15   : > { %v345_v33 = vrot.slane %v338_v26, 1  ;;  %v347_v36 = vrot.slane %v339_v27, 1  ;;  %v344_v37 = vrot.slane %v337_v28, 1 }
  0x16   : > { %211 = vrot.lane.b32.xlu1 %v208_v10, %s618_s24  ;;  %v210_v13 = vsel %vm207_vm0, %v208_v10, %v209_v11 }
  0x17   : > { %213 = vrot.lane.b32.xlu0 %v210_v13, %s618_s24  ;;  %v348_v41 = vsel %vm343_vm1, %v345_v33, %v347_v36  ;;  %v346_v42 = vsel %vm343_vm1, %v344_v37, %v345_v33 }
  0x1a   : > { %215 = vrot.lane.b32.xlu1 %v209_v11, %s618_s24 }
  0x1b   : > { %291 = vrot.lane.b32.xlu0 %v284_v14, %s618_s24 }
  0x1e   : > { %289 = vrot.lane.b32.xlu1 %v283_v15, %s618_s24 }
  0x1f   : > { %368 = vrot.lane.b32.xlu0 %v590_v17, %s618_s24 }
  0x22   : > { %293 = vrot.lane.b32.xlu1 %v285_v18, %s618_s24 }
  0x78   : > { %v254_v19 = vpop.permute.xlu0 %253  ;;  %v396_v31 = vpop.permute.xlu1 %395 }
  0x79   : > { %v256_v22 = vmul.f32 %v254_v19, %v674_v6  ;;  %v257_v25 = vmul.f32 %v254_v19, %v676_v7  ;;  %v398_v34 = vmul.f32 %v396_v31, %v674_v6  ;;  %v399_v35 = vmul.f32 %v396_v31, %v676_v7 }
  0x7a   : > { %v400_v43 = vmul.f32 %v396_v31, %v691_v16 }
  0x7b   : > { %v260_v29 = vrot.slane %v256_v22, 7  ;;  %v261_v32 = vrot.slane %v257_v25, 7  ;;  %v404_v39 = vrot.slane %v398_v34, 1  ;;  %v405_v40 = vrot.slane %v399_v35, 1 }
  0x7c   : > { %v309_v20 = vpop.permute.xlu0 %308  ;;  %v407_v45 = vrot.slane %v400_v43, 1  ;;  %v231_v47 = vpop.permute.xlu1 %230 }
  0x7d   : > { %v311_v23 = vmul.f32 %v309_v20, %v674_v6  ;;  %v312_v24 = vmul.f32 %v309_v20, %v676_v7  ;;  %v313_v30 = vmul.f32 %v309_v20, %v691_v16  ;;  %v262_v38 = vsel %vm207_vm0, %v260_v29, %v261_v32 }
  0x7e   : > { %v406_v44 = vsel %vm343_vm1, %v404_v39, %v405_v40  ;;  %v408_v46 = vsel %vm343_vm1, %v405_v40, %v407_v45  ;;  %v233_v56 = vmul.f32 %v231_v47, %v674_v6  ;;  %v234_v58 = vmul.f32 %v231_v47, %v676_v7 }
  0x7f   : > { %317 = vrot.lane.b32.xlu1 %v311_v23, %s619_s11  ;;  %319 = vrot.lane.b32.xlu0 %v312_v24, %s619_s11 }
  0x80   : > { %v191_v49 = vpop.permute.xlu0 %190  ;;  %v237_v59 = vrot.slane %v233_v56, 7  ;;  %v238_v63 = vrot.slane %v234_v58, 7 }
  0x81   : > { %v193_v57 = vmul.f32 %v191_v49, %v674_v6  ;;  %v195_v60 = vmul.f32 %v191_v49, %v691_v16  ;;  %v194_v61 = vmul.f32 %v191_v49, %v676_v7 }
  0x82   : > { %v239_v9 = vsel %vm207_vm0, %v237_v59, %v238_v63 }
  0x83   : > { %321 = vrot.lane.b32.xlu1 %v313_v30, %s619_s11  ;;  %263 = vrot.lane.b32.xlu0 %v260_v29, %s619_s11 }
  0x87   : > { %265 = vrot.lane.b32.xlu1 %v262_v38, %s619_s11  ;;  %267 = vrot.lane.b32.xlu0 %v261_v32, %s619_s11 }
  0x88   : > { %v212_v48 = vpop.permute.xlu1 %211 }
  0x89   : > { %v214_v51 = vpop.permute.xlu0 %213  ;;  %v220_v62 = vadd.f32 %v212_v48, %v193_v57 }
  0x8a   : > { %v221_v3 = vadd.f32 %v214_v51, %v194_v61 }
  0x8b   : > { %351 = vrot.lane.b32.xlu1 %v348_v41, %s618_s24  ;;  %349 = vrot.lane.b32.xlu0 %v346_v42, %s618_s24  ;;  %v243_v4 = vadd.f32 %v237_v59, %v220_v62 }
  0x8c   : > { %v216_v50 = vpop.permute.xlu1 %215  ;;  %v244_v14 = vadd.f32 %v239_v9, %v221_v3 }
  0x8d   : > { %v292_v53 = vpop.permute.xlu0 %291  ;;  %v222_v2 = vadd.f32 %v216_v50, %v195_v60 }
  0x8f   : > { %409 = vrot.lane.b32.xlu1 %v406_v44, %s619_s11  ;;  %353 = vrot.lane.b32.xlu0 %v347_v36, %s618_s24  ;;  %v245_v15 = vadd.f32 %v238_v63, %v222_v2 }
  0x90   : > { %v290_v52 = vpop.permute.xlu1 %289 }
  0x91   : > { %v369_v55 = vpop.permute.xlu0 %368 }
  0x92   : > { %v371_v11 = vmul.f32 %v369_v55, %v674_v6  ;;  %v372_v12 = vmul.f32 %v369_v55, %v676_v7  ;;  %v373_v21 = vmul.f32 %v369_v55, %v691_v16 }
  0x93   : > { %413 = vrot.lane.b32.xlu1 %v407_v45, %s619_s11  ;;  %411 = vrot.lane.b32.xlu0 %v408_v46, %s619_s11 }
  0x94   : > { %v294_v54 = vpop.permute.xlu1 %293  ;;  %v377_v22 = vrot.slane %v371_v11, 1  ;;  %v378_v23 = vrot.slane %v372_v12, 1  ;;  %v380_v30 = vrot.slane %v373_v21, 1 }
  0x96   : > { %v379_v7 = vsel %vm343_vm1, %v377_v22, %v378_v23  ;;  %v381_v16 = vsel %vm343_vm1, %v378_v23, %v380_v30 }
  0xf1   : > { %v318_v0 = vpop.permute.xlu1 %317  ;;  %v320_v1 = vpop.permute.xlu0 %319 }
  0xf5   : > { %v322_v5 = vpop.permute.xlu1 %321  ;;  %v264_v8 = vpop.permute.xlu0 %263 }
  0xf6   : > { %v272_v10 = vadd.f32 %v264_v8, %v243_v4 }
  0xf8   : > { %v298_v13 = vadd.f32 %v290_v52, %v272_v10 }
  0xf9   : > { %v266_v17 = vpop.permute.xlu1 %265  ;;  %v268_v18 = vpop.permute.xlu0 %267 }
  0xfa   : > { %v273_v19 = vadd.f32 %v266_v17, %v244_v14  ;;  %v274_v20 = vadd.f32 %v268_v18, %v245_v15  ;;  %v326_v26 = vadd.f32 %v318_v0, %v298_v13 }
  0xfc   : > { %v299_v24 = vadd.f32 %v292_v53, %v273_v19  ;;  %v300_v25 = vadd.f32 %v294_v54, %v274_v20 }
  0xfd   : > { %v352_v27 = vpop.permute.xlu1 %351  ;;  %v350_v28 = vpop.permute.xlu0 %349 }
  0xfe   : > { %v327_v29 = vadd.f32 %v320_v1, %v299_v24  ;;  %v358_v6 = vadd.f32 %v350_v28, %v326_v26  ;;  %v328_v33 = vadd.f32 %v322_v5, %v300_v25 }
 0x100   : > { %v359_v31 = vadd.f32 %v352_v27, %v327_v29  ;;  %v385_v32 = vadd.f32 %v379_v7, %v358_v6 }
 0x101   : > { %v410_v34 = vpop.permute.xlu1 %409  ;;  %v354_v35 = vpop.permute.xlu0 %353 }
 0x102   : > { %v418_v36 = vadd.f32 %v410_v34, %v385_v32  ;;  %v360_v37 = vadd.f32 %v354_v35, %v328_v33  ;;  %v386_v39 = vadd.f32 %v381_v16, %v359_v31 }
 0x104   : > { %424 = vrot.lane.b32.xlu0 %v418_v36, %s619_s11  ;;  %v387_v38 = vadd.f32 %v380_v30, %v360_v37  ;;  %v456_v40 = vmul.f32 %v418_v36, %v418_v36  ;;  %v439_v45 = vrot.slane %v418_v36, 1 }
 0x105   : > { %v414_v41 = vpop.permute.xlu1 %413  ;;  %v412_v42 = vpop.permute.xlu0 %411 }
 0x106   : > { %v420_v43 = vadd.f32 %v414_v41, %v387_v38  ;;  %v419_v44 = vadd.f32 %v412_v42, %v386_v39  ;;  %v462_v50 = vrot.slane %v456_v40, 1 }
 0x108   : > { %v442_v46 = vrot.slane %v420_v43, 1  ;;  %v458_v47 = vmul.f32 %v420_v43, %v420_v43  ;;  %v440_v48 = vrot.slane %v419_v44, 1  ;;  %v457_v49 = vmul.f32 %v419_v44, %v419_v44 }
 0x10a   : > { %v465_v51 = vrot.slane %v458_v47, 1  ;;  %v441_v52 = vsel %vm343_vm1, %v439_v45, %v440_v48  ;;  %v443_v53 = vsel %vm343_vm1, %v440_v48, %v442_v46  ;;  %v463_v54 = vrot.slane %v457_v49, 1 }
 0x10b   : > { %v447_v55 = vsel %vm446_vm2, %v441_v52, 0.0  ;;  %v448_v56 = vsel %vm446_vm2, %v443_v53, 0.0 }
 0x10c   : > { %v464_v57 = vsel %vm343_vm1, %v462_v50, %v463_v54  ;;  %v466_v58 = vsel %vm343_vm1, %v463_v54, %v465_v51  ;;  %v449_v59 = vadd.f32 %v448_v56, %v447_v55 }
 0x10d   : > { %v469_v60 = vsel %vm446_vm2, %v464_v57, 0.0  ;;  %v470_v61 = vsel %vm446_vm2, %v466_v58, 0.0 }
 0x10e   : > { %v450_v62 = vrot.slane %v449_v59, 4  ;;  %v471_v63 = vadd.f32 %v470_v61, %v469_v60 }
 0x110   : > { %v451_v0 = vadd.f32 %v450_v62, %v449_v59  ;;  %v472_v1 = vrot.slane %v471_v63, 4 }
 0x112   : > { %v452_v2 = vrot.slane %v451_v0, 2  ;;  %v473_v3 = vadd.f32 %v472_v1, %v471_v63 }
 0x114   : > { %v453_v4 = vadd.f32 %v452_v2, %v451_v0  ;;  %v474_v5 = vrot.slane %v473_v3, 2 }
 0x116   : > { %v454_v8 = vrot.slane %v453_v4, 1  ;;  %v475_v9 = vadd.f32 %v474_v5, %v473_v3 }
 0x118   : > { %v455_v10 = vadd.f32 %v454_v8, %v453_v4  ;;  %v476_v11 = vrot.slane %v475_v9, 1 }
 0x11a   : > { %479 = vrot.lane.b32.xlu0 %v455_v10, %s619_s11  ;;  %v477_v12 = vadd.f32 %v476_v11, %v475_v9 }
 0x11c   : > { %483 = vrot.lane.b32.xlu1 %v477_v12, %s620_s14 }
 0x11e   : > { %428 = vrot.lane.b32.xlu0 %v420_v43, %s619_s11 }
 0x120   : > { %426 = vrot.lane.b32.xlu1 %v419_v44, %s619_s11 }
 0x176   : > { %v425_v13 = vpop.permute.xlu0 %424 }
 0x177   : > { %434 = vst.msk [vmem:[%s176_s18 - $0x1] sm:$0xfe] %vm433_vm3, %v425_v13 }
 0x18c   : > { %v480_v14 = vpop.permute.xlu0 %479 }
 0x18e   : > { %v484_v15 = vpop.permute.xlu1 %483 }
 0x18f   : > { %v486_v17 = vsel %vm435_vm4, %v480_v14, %v484_v15 }
 0x190   : > { %487 = vst [vmem:[%s179_s21] sm:$0x1] %v486_v17  ;;  %v429_v18 = vpop.permute.xlu0 %428 }
 0x191   : > { %438 = vst.msk [vmem:[%s176_s18 + $0xf] sm:$0x1] %vm437_vm5, %v429_v18 }
 0x192   : > { %v427_v19 = vpop.permute.xlu1 %426 }
 0x193   : > { %436 = vst.msk [vmem:[%s176_s18 + $0x7] sm:$0xff] %vm435_vm4, %v427_v19 }
 0x194 PF: > { %s14_s12 = sadd.s32 1, %s615_s12  }
 0x195   : > { %p11_p4 = scmp.ge.s32.totalorder %s14_s12, 4  }
 0x197   :  { %13 = sbr.rel (!%p11_p4) target bundleno = 1 (0x1), region = 78 }

// kernel: depth_separable_convolution.5
= control target key start
LH: loop header
LB: loop body
LE: loop exit
PB: predicated region body
PF: predicated region fallthrough
CT: control target
= control target key end

     0   :  { %s303_s12 = smov 0   ;;  %s320_s0 = inlined_call_operand.vmem [shape: f32[32,128], index: 0, kind: input, shape index: {}]   ;;  %s321_s1 = inlined_call_operand.vmem [shape: f32[1,128], index: 1, kind: input, shape index: {}]   ;;  %s322_s2 = inlined_call_operand.vmem [shape: f32[1,128], index: 2, kind: input, shape index: {}]   ;;  %s323_s3 = inlined_call_operand.vmem [shape: f32[32,128], index: 3, kind: output, shape index: {}]  }
   0x1 LB: > { %s254_s13 = sadd.s32 4294967295, %s281_s12   ;;  %p258_p0 = scmp.ge.s32.totalorder %s281_s12, 1  ;;  %s281_s12 = sphi %s303_s12, %s13_s12  }
   0x2   : > { %p138_p1 = scmp.lt.s32.totalorder %s281_s12, 3 }
   0x4   : > { %p139_p2 = pnand %p258_p0, %p138_p1 }
   0x5   : > { %s259_s14 = sshll.u32 (!%p139_p2), %s254_s13, 1  ;;  %v263_v0 = vld [vmem:[%s321_s1] ss:$0 sm:$0xff] (!%p139_p2) }
   0x6   : > { %142 = sbr.rel (%p139_p2) target bundleno = 24 (0x18), region = 32  ;;  %p163_p3 = scmp.lt.s32.totalorder (!%p139_p2), %s259_s14, 3  ;;  %v264_v3 = vld [vmem:[%s322_s2] ss:$0 sm:$0xff] (!%p139_p2) }
   0xd   : > { %s325_s14 = smov (!%p163_p3, %s259_s14), 3 }
   0xe   : > { %s260_s15 = sshll.u32 %s325_s14, 3 }
   0xf   : > { %s166_s20 = scalar_lea.vmem %s320_s0, %s260_s15  ;;  %s172_s25 = scalar_lea.vmem %s323_s3, %s260_s15 }
  0x10   : > { %v174_v1 = vld [vmem:[%s166_s20] sm:$0xff]  ;;  %v175_v2 = vld [vmem:[%s166_s20 + $0x8] sm:$0xff] }
  0x11   : > { %v183_v4 = vmul.f32 %v263_v0, %v174_v1  ;;  %v184_v5 = vmul.f32 %v263_v0, %v175_v2 }
  0x13   : > { %v192_v6 = vadd.f32 %v264_v3, %v183_v4  ;;  %v193_v7 = vadd.f32 %v264_v3, %v184_v5 }
  0x15   : > { %v194_v8 = vmax.f32 %v192_v6, 0.0  ;;  %v195_v9 = vmax.f32 %v193_v7, 0.0 }
  0x17   : > { %196 = vst [vmem:[%s172_s25] sm:$0xff] %v194_v8  ;;  %197 = vst [vmem:[%s172_s25 + $0x8] sm:$0xff] %v195_v9 }
  0x18 PF: > { %s13_s12 = sadd.s32 1, %s281_s12  }
  0x19   : > { %p10_p4 = scmp.ge.s32.totalorder %s13_s12, 4  }
  0x1b   :  { %12 = sbr.rel (!%p10_p4) target bundleno = 1 (0x1), region = 62 }

</bundles_post_ra>
